<compile_context>
chip_gen: v7x
topology: tpu7x:2x2x1
jax: 0.10.0
libtpu: 0.0.40
codegen_flags: <defaults>
</compile_context>

<pallas_src>
import functools
import math

import jax
import jax.numpy as jnp
from jax.experimental import pallas as pl
from jax.experimental.pallas import tpu as pltpu  # noqa: F401  (kept for TPU-specific tuning hooks)


LANE = 128                      # lane-dense padded feature width of every activation / weight tile
MATMUL_DTYPE = jnp.bfloat16     # MXU operand dtype (set to jnp.float32 to recover 1e-3 agreement)


# ----------------------------- fused kernel -------------------------------- #

def fused_gcn_kernel(x_ref, adj_ref, w_ref, aff_ref, o_ref, *,
                     num_stage, batch, node_n, mm_dtype):
    """Entire GCN_corr forward (eval mode) for all batch elements in one invocation.

    x_ref   : (B*N, 128) f32      input, zero-padded in lanes [Fin:128)
    adj_ref : ((3+2*S)*B*N, B*N)  bf16 block-diag adjacencies
              [A_in, A1_0, A2_0, ..., A1_{S-1}, A2_{S-1}, A_out, A_att]
    w_ref   : ((2+2*S)*128, 128)  bf16 zero-padded weights
              [W_in, W1_0, W2_0, ..., W_pack(=[W_out | W_att | 0])]
    aff_ref : ((1+2*S)*2*N + 2, 128) f32 per-layer BN scale / shift (GC bias folded
              into shift), followed by the packed gcout/gcatt bias rows
    o_ref   : (2*B*N, 128) f32    rows [0,BN): gcout result (lanes [0,Fin));
                                  rows [BN,2BN): sigmoid(gcatt) (lane Fin)
    """
    f32 = jnp.float32
    BN = batch * node_n

    def weight(k):                              # k-th (128, 128) padded weight tile (bf16)
        return w_ref[k * LANE:(k + 1) * LANE, :]

    def adjacency(k, rows=1):                   # k-th (rows*BN, BN) block-diag adjacency (bf16)
        return adj_ref[k * BN:(k + rows) * BN, :]

    def graph_conv(y, k):                       # adj @ (y @ W): two bf16 MXU matmuls, f32 accum
        supp = jnp.dot(y.astype(mm_dtype), weight(k), preferred_element_type=f32)
        return jnp.dot(adjacency(k), supp.astype(mm_dtype), preferred_element_type=f32)

    def bn_relu(t, r):                          # folded BN (+ GC bias) + ReLU; dropout = identity
        sc = aff_ref[r:r + node_n, :]
        sh = aff_ref[r + node_n:r + 2 * node_n, :]
        if batch > 1:                           # broadcast (N,128) -> (BN,128) inside the kernel
            sc = jnp.concatenate([sc] * batch, axis=0)
            sh = jnp.concatenate([sh] * batch, axis=0)
        return jnp.maximum(t * sc + sh, 0.0)

    # gcin -> bn1 -> ReLU (dropout = identity)
    y = bn_relu(graph_conv(x_ref[...], 0), 0)

    # residual GC blocks: GC -> BN -> ReLU -> GC -> BN -> ReLU -> +x
    for i in range(num_stage):
        r = (1 + 2 * i) * 2 * node_n
        t = bn_relu(graph_conv(y, 1 + 2 * i), r)
        t = bn_relu(graph_conv(t, 2 + 2 * i), r + 2 * node_n)
        y = y + t

    # Merged gcout + gcatt: one packed-weight matmul, one stacked-adjacency matmul.
    k_last = 1 + 2 * num_stage
    sp = jnp.dot(y.astype(mm_dtype), weight(k_last), preferred_element_type=f32)         # (BN, 128)
    z = jnp.dot(adjacency(k_last, rows=2), sp.astype(mm_dtype),
                preferred_element_type=f32)                                              # (2BN, 128)

    rb = (1 + 2 * num_stage) * 2 * node_n
    b_out = aff_ref[rb:rb + 1, :]               # gcout bias in lanes [0, Fin)
    b_att = aff_ref[rb + 1:rb + 2, :]           # gcatt bias in lane Fin
    row = jax.lax.broadcasted_iota(jnp.int32, z.shape, 0)
    is_out = row < BN
    z = z + jnp.where(is_out, b_out, b_att)
    o_ref[...] = jnp.where(is_out, z, jax.nn.sigmoid(z))   # single lane-dense full-width store


# ----------------------------- host-side packing (one-time) ----------------- #

def pack_params(params, batch, node_n, fin, hid):
    """Pack all parameters into 3 contiguous slabs. Runs ONCE at load time, not per call."""
    f32 = jnp.float32
    assert fin + 1 <= LANE, "packed gcout/gcatt requires input_feature + 1 <= 128"
    assert hid <= LANE, "hidden_feature must fit the 128-lane activation slab"

    eye_b = jnp.eye(batch, dtype=f32)

    def blk(adj):
        # Replicate the shared learnable (N,N) adjacency into block-diag (BN,BN).
        return jnp.kron(eye_b, adj)

    def pad_to(a, rows, cols):
        return jnp.zeros((rows, cols), f32).at[:a.shape[0], :a.shape[1]].set(a)

    w_in, a_in, b_in, s_in, sh_in = params["gcin"]
    adj_parts = [blk(a_in)]
    w_parts = [pad_to(w_in, LANE, LANE)]
    # (adj@(x@W) + b) * scale + shift == scale*(adj@(x@W)) + (shift + scale*b)
    aff_parts = [pad_to(s_in, node_n, LANE), pad_to(sh_in + s_in * b_in, node_n, LANE)]

    for (w1, a1, b1, s1, sh1, w2, a2, b2, s2, sh2) in params["gcbs"]:
        adj_parts += [blk(a1), blk(a2)]
        w_parts += [pad_to(w1, LANE, LANE), pad_to(w2, LANE, LANE)]
        aff_parts += [pad_to(s1, node_n, LANE), pad_to(sh1 + s1 * b1, node_n, LANE),
                      pad_to(s2, node_n, LANE), pad_to(sh2 + s2 * b2, node_n, LANE)]

    w_out, a_out, b_out = params["gcout"]
    w_att, a_att, b_att = params["gcatt"]
    adj_parts += [blk(a_out), blk(a_att)]        # stacked -> one (2BN, BN) LHS in the kernel
    w_pack = (jnp.zeros((LANE, LANE), f32)
              .at[:hid, :fin].set(w_out)
              .at[:hid, fin:fin + 1].set(w_att))
    w_parts += [w_pack]
    aff_parts += [pad_to(b_out, 1, LANE),
                  jnp.zeros((1, LANE), f32).at[:, fin:fin + 1].set(b_att)]

    adj_slab = jnp.concatenate(adj_parts, axis=0).astype(MATMUL_DTYPE)
    w_slab = jnp.concatenate(w_parts, axis=0).astype(MATMUL_DTYPE)
    aff_slab = jnp.concatenate(aff_parts, axis=0)          # stays f32 (VPU epilogue)
    return adj_slab, w_slab, aff_slab


def make_gcn_corr_forward(params, batch, node_n, fin, hid):
    """Build a jitted forward function; all packing is hoisted out of the per-call path."""
    num_stage = len(params["gcbs"])
    BN = batch * node_n
    adj_slab, w_slab, aff_slab = pack_params(params, batch, node_n, fin, hid)

    kernel = functools.partial(fused_gcn_kernel, num_stage=num_stage,
                               batch=batch, node_n=node_n, mm_dtype=MATMUL_DTYPE)
    # No grid: one invocation, every operand a whole-array VMEM block (~0.4 MiB total),
    # so there are only 4 input DMAs + 1 output DMA and no per-step pipeline overhead.
    call = pl.pallas_call(
        kernel,
        out_shape=jax.ShapeDtypeStruct((2 * BN, LANE), jnp.float32),
    )

    @jax.jit
    def fwd(x, adj_slab, w_slab, aff_slab):
        x_pad = jnp.zeros((BN, LANE), jnp.float32).at[:, :fin].set(x.reshape(BN, fin))
        slab = call(x_pad, adj_slab, w_slab, aff_slab)
        out = slab[:BN, :fin].reshape(batch, node_n, fin)
        att = slab[BN:, fin:fin + 1].reshape(batch, node_n, 1)
        return out, att

    return lambda x: fwd(x, adj_slab, w_slab, aff_slab)


# ----------------------------- param init ---------------------------------- #

def _uniform(key, shape, stdv):
    return jax.random.uniform(key, shape, jnp.float32, -stdv, stdv)


def init_graph_conv(key, fin, fout, node_n):
    # mirrors GraphConvolution.reset_parameters: U(-1/sqrt(out), 1/sqrt(out))
    stdv = 1.0 / math.sqrt(fout)
    k1, k2, k3 = jax.random.split(key, 3)
    w = _uniform(k1, (fin, fout), stdv)
    adj = _uniform(k2, (node_n, node_n), stdv)
    b = _uniform(k3, (1, fout), stdv)
    return w, adj, b


def init_bn(key, num_features, node_n, feat, eps=1e-5):
    # BatchNorm1d(node_n*feat) in eval mode, folded to per-(node,feat) scale/shift.
    k1, k2 = jax.random.split(key)
    gamma = 1.0 + 0.1 * jax.random.normal(k1, (num_features,), jnp.float32)
    beta = 0.1 * jax.random.normal(k2, (num_features,), jnp.float32)
    running_mean = jnp.zeros((num_features,), jnp.float32)
    running_var = jnp.ones((num_features,), jnp.float32)
    scale = gamma / jnp.sqrt(running_var + eps)
    shift = beta - running_mean * scale
    # view(b, -1) in torch flattens (node, feat) row-major -> reshape back to (node, feat)
    return scale.reshape(node_n, feat), shift.reshape(node_n, feat)


# ----------------------------- pure-JAX reference -------------------------- #

def ref_forward(x, params):
    def gc(h, w, adj, b):
        return jnp.einsum("ij,bjk->bik", adj, jnp.matmul(h, w)) + b

    w, adj, b, s, sh = params["gcin"]
    y = jnp.maximum(gc(x, w, adj, b) * s + sh, 0.0)
    for (w1, a1, b1, s1, sh1, w2, a2, b2, s2, sh2) in params["gcbs"]:
        t = jnp.maximum(gc(y, w1, a1, b1) * s1 + sh1, 0.0)
        t = jnp.maximum(gc(t, w2, a2, b2) * s2 + sh2, 0.0)
        y = t + y
    w, adj, b = params["gcout"]
    out = gc(y, w, adj, b)
    w, adj, b = params["gcatt"]
    att = jax.nn.sigmoid(gc(y, w, adj, b))
    return out, att


# ----------------------------- main ----------------------------------------- #

if __name__ == "__main__":
    B, NODE_N, FIN, HID, NUM_STAGE = 2, 16, 8, 32, 2

    keys = jax.random.split(jax.random.PRNGKey(0), 16)
    params = {}

    w, adj, b = init_graph_conv(keys[0], FIN, HID, NODE_N)
    s, sh = init_bn(keys[1], NODE_N * HID, NODE_N, HID)
    params["gcin"] = (w, adj, b, s, sh)

    blocks = []
    kidx = 2
    for _ in range(NUM_STAGE):
        w1, a1, b1 = init_graph_conv(keys[kidx], HID, HID, NODE_N)
        s1, sh1 = init_bn(keys[kidx + 1], NODE_N * HID, NODE_N, HID)
        w2, a2, b2 = init_graph_conv(keys[kidx + 2], HID, HID, NODE_N)
        s2, sh2 = init_bn(keys[kidx + 3], NODE_N * HID, NODE_N, HID)
        kidx += 4
        blocks.append((w1, a1, b1, s1, sh1, w2, a2, b2, s2, sh2))
    params["gcbs"] = blocks

    params["gcout"] = init_graph_conv(keys[kidx], HID, FIN, NODE_N)
    params["gcatt"] = init_graph_conv(keys[kidx + 1], HID, 1, NODE_N)

    x = jax.random.normal(keys[kidx + 2], (B, NODE_N, FIN), jnp.float32)

    forward = make_gcn_corr_forward(params, B, NODE_N, FIN, HID)   # one-time packing + jit
    out, att = forward(x)
    jax.block_until_ready((out, att))

    ref_out, ref_att = ref_forward(x, params)
    # bf16 MXU operands (f32 accumulation) -> looser tolerance than the pure-f32 1e-3 check.
    tol = 1e-3 if MATMUL_DTYPE == jnp.float32 else 4e-2
    assert out.shape == (B, NODE_N, FIN) and att.shape == (B, NODE_N, 1)
    assert jnp.allclose(out, ref_out, atol=tol, rtol=tol)
    assert jnp.allclose(att, ref_att, atol=tol, rtol=tol)

    print("KERNEL_OK")
</pallas_src>

<mosaic_0001>
module attributes {stable_mosaic.version = 11 : i64} {
  func.func @fused_gcn_kernel(%arg0: memref<32x128xf32, #tpu.memory_space<vmem>>, %arg1: memref<224x32xbf16, #tpu.memory_space<vmem>>, %arg2: memref<768x128xbf16, #tpu.memory_space<vmem>>, %arg3: memref<162x128xf32, #tpu.memory_space<vmem>>, %arg4: memref<64x128xf32, #tpu.memory_space<vmem>>) attributes {dimension_semantics = [], scalar_prefetch = 0 : i64, scratch_operands = 0 : i64, tpu.core_type = #tpu.core_type<tc>} {
    %c0 = arith.constant 0 : index
    %c0_0 = arith.constant 0 : index
    %0 = vector.load %arg0[%c0, %c0_0] : memref<32x128xf32, #tpu.memory_space<vmem>>, vector<32x128xf32>
    %1 = arith.truncf %0 : vector<32x128xf32> to vector<32x128xbf16>
    %c0_1 = arith.constant 0 : index
    %c0_2 = arith.constant 0 : index
    %2 = vector.load %arg2[%c0_1, %c0_2] : memref<768x128xbf16, #tpu.memory_space<vmem>>, vector<128x128xbf16>
    %cst = arith.constant dense<0.000000e+00> : vector<32x128xf32>
    %3 = tpu.matmul %1, %2, %cst {dimension_numbers = #tpu.dot_dimension_numbers<[1], [0], [0], [1], [0, 0, 1, 1], [], []>} : vector<32x128xbf16>, vector<128x128xbf16>, vector<32x128xf32> -> vector<32x128xf32>
    %c0_3 = arith.constant 0 : index
    %c0_4 = arith.constant 0 : index
    %4 = vector.load %arg1[%c0_3, %c0_4] : memref<224x32xbf16, #tpu.memory_space<vmem>>, vector<32x32xbf16>
    %5 = arith.truncf %3 : vector<32x128xf32> to vector<32x128xbf16>
    %cst_5 = arith.constant dense<0.000000e+00> : vector<32x128xf32>
    %6 = tpu.matmul %4, %5, %cst_5 {dimension_numbers = #tpu.dot_dimension_numbers<[1], [0], [0], [1], [0, 0, 1, 1], [], []>} : vector<32x32xbf16>, vector<32x128xbf16>, vector<32x128xf32> -> vector<32x128xf32>
    %c0_6 = arith.constant 0 : index
    %c0_7 = arith.constant 0 : index
    %7 = vector.load %arg3[%c0_6, %c0_7] : memref<162x128xf32, #tpu.memory_space<vmem>>, vector<16x128xf32>
    %c16 = arith.constant 16 : index
    %c0_8 = arith.constant 0 : index
    %8 = vector.load %arg3[%c16, %c0_8] : memref<162x128xf32, #tpu.memory_space<vmem>>, vector<16x128xf32>
    %9 = tpu.concatenate %7, %7 in 0 : vector<16x128xf32>, vector<16x128xf32> -> vector<32x128xf32>
    %10 = tpu.concatenate %8, %8 in 0 : vector<16x128xf32>, vector<16x128xf32> -> vector<32x128xf32>
    %11 = arith.mulf %6, %9 : vector<32x128xf32>
    %12 = arith.addf %11, %10 : vector<32x128xf32>
    %cst_9 = arith.constant 0.000000e+00 : f32
    %13 = vector.broadcast %cst_9 : f32 to vector<32x128xf32>
    %14 = arith.maximumf %12, %13 : vector<32x128xf32>
    %15 = arith.truncf %14 : vector<32x128xf32> to vector<32x128xbf16>
    %c128 = arith.constant 128 : index
    %c0_10 = arith.constant 0 : index
    %16 = vector.load %arg2[%c128, %c0_10] : memref<768x128xbf16, #tpu.memory_space<vmem>>, vector<128x128xbf16>
    %cst_11 = arith.constant dense<0.000000e+00> : vector<32x128xf32>
    %17 = tpu.matmul %15, %16, %cst_11 {dimension_numbers = #tpu.dot_dimension_numbers<[1], [0], [0], [1], [0, 0, 1, 1], [], []>} : vector<32x128xbf16>, vector<128x128xbf16>, vector<32x128xf32> -> vector<32x128xf32>
    %c32 = arith.constant 32 : index
    %c0_12 = arith.constant 0 : index
    %18 = vector.load %arg1[%c32, %c0_12] : memref<224x32xbf16, #tpu.memory_space<vmem>>, vector<32x32xbf16>
    %19 = arith.truncf %17 : vector<32x128xf32> to vector<32x128xbf16>
    %cst_13 = arith.constant dense<0.000000e+00> : vector<32x128xf32>
    %20 = tpu.matmul %18, %19, %cst_13 {dimension_numbers = #tpu.dot_dimension_numbers<[1], [0], [0], [1], [0, 0, 1, 1], [], []>} : vector<32x32xbf16>, vector<32x128xbf16>, vector<32x128xf32> -> vector<32x128xf32>
    %c32_14 = arith.constant 32 : index
    %c0_15 = arith.constant 0 : index
    %21 = vector.load %arg3[%c32_14, %c0_15] : memref<162x128xf32, #tpu.memory_space<vmem>>, vector<16x128xf32>
    %c48 = arith.constant 48 : index
    %c0_16 = arith.constant 0 : index
    %22 = vector.load %arg3[%c48, %c0_16] : memref<162x128xf32, #tpu.memory_space<vmem>>, vector<16x128xf32>
    %23 = tpu.concatenate %21, %21 in 0 : vector<16x128xf32>, vector<16x128xf32> -> vector<32x128xf32>
    %24 = tpu.concatenate %22, %22 in 0 : vector<16x128xf32>, vector<16x128xf32> -> vector<32x128xf32>
    %25 = arith.mulf %20, %23 : vector<32x128xf32>
    %26 = arith.addf %25, %24 : vector<32x128xf32>
    %cst_17 = arith.constant 0.000000e+00 : f32
    %27 = vector.broadcast %cst_17 : f32 to vector<32x128xf32>
    %28 = arith.maximumf %26, %27 : vector<32x128xf32>
    %29 = arith.truncf %28 : vector<32x128xf32> to vector<32x128xbf16>
    %c256 = arith.constant 256 : index
    %c0_18 = arith.constant 0 : index
    %30 = vector.load %arg2[%c256, %c0_18] : memref<768x128xbf16, #tpu.memory_space<vmem>>, vector<128x128xbf16>
    %cst_19 = arith.constant dense<0.000000e+00> : vector<32x128xf32>
    %31 = tpu.matmul %29, %30, %cst_19 {dimension_numbers = #tpu.dot_dimension_numbers<[1], [0], [0], [1], [0, 0, 1, 1], [], []>} : vector<32x128xbf16>, vector<128x128xbf16>, vector<32x128xf32> -> vector<32x128xf32>
    %c64 = arith.constant 64 : index
    %c0_20 = arith.constant 0 : index
    %32 = vector.load %arg1[%c64, %c0_20] : memref<224x32xbf16, #tpu.memory_space<vmem>>, vector<32x32xbf16>
    %33 = arith.truncf %31 : vector<32x128xf32> to vector<32x128xbf16>
    %cst_21 = arith.constant dense<0.000000e+00> : vector<32x128xf32>
    %34 = tpu.matmul %32, %33, %cst_21 {dimension_numbers = #tpu.dot_dimension_numbers<[1], [0], [0], [1], [0, 0, 1, 1], [], []>} : vector<32x32xbf16>, vector<32x128xbf16>, vector<32x128xf32> -> vector<32x128xf32>
    %c64_22 = arith.constant 64 : index
    %c0_23 = arith.constant 0 : index
    %35 = vector.load %arg3[%c64_22, %c0_23] : memref<162x128xf32, #tpu.memory_space<vmem>>, vector<16x128xf32>
    %c80 = arith.constant 80 : index
    %c0_24 = arith.constant 0 : index
    %36 = vector.load %arg3[%c80, %c0_24] : memref<162x128xf32, #tpu.memory_space<vmem>>, vector<16x128xf32>
    %37 = tpu.concatenate %35, %35 in 0 : vector<16x128xf32>, vector<16x128xf32> -> vector<32x128xf32>
    %38 = tpu.concatenate %36, %36 in 0 : vector<16x128xf32>, vector<16x128xf32> -> vector<32x128xf32>
    %39 = arith.mulf %34, %37 : vector<32x128xf32>
    %40 = arith.addf %39, %38 : vector<32x128xf32>
    %cst_25 = arith.constant 0.000000e+00 : f32
    %41 = vector.broadcast %cst_25 : f32 to vector<32x128xf32>
    %42 = arith.maximumf %40, %41 : vector<32x128xf32>
    %43 = arith.addf %14, %42 : vector<32x128xf32>
    %44 = arith.truncf %43 : vector<32x128xf32> to vector<32x128xbf16>
    %c384 = arith.constant 384 : index
    %c0_26 = arith.constant 0 : index
    %45 = vector.load %arg2[%c384, %c0_26] : memref<768x128xbf16, #tpu.memory_space<vmem>>, vector<128x128xbf16>
    %cst_27 = arith.constant dense<0.000000e+00> : vector<32x128xf32>
    %46 = tpu.matmul %44, %45, %cst_27 {dimension_numbers = #tpu.dot_dimension_numbers<[1], [0], [0], [1], [0, 0, 1, 1], [], []>} : vector<32x128xbf16>, vector<128x128xbf16>, vector<32x128xf32> -> vector<32x128xf32>
    %c96 = arith.constant 96 : index
    %c0_28 = arith.constant 0 : index
    %47 = vector.load %arg1[%c96, %c0_28] : memref<224x32xbf16, #tpu.memory_space<vmem>>, vector<32x32xbf16>
    %48 = arith.truncf %46 : vector<32x128xf32> to vector<32x128xbf16>
    %cst_29 = arith.constant dense<0.000000e+00> : vector<32x128xf32>
    %49 = tpu.matmul %47, %48, %cst_29 {dimension_numbers = #tpu.dot_dimension_numbers<[1], [0], [0], [1], [0, 0, 1, 1], [], []>} : vector<32x32xbf16>, vector<32x128xbf16>, vector<32x128xf32> -> vector<32x128xf32>
    %c96_30 = arith.constant 96 : index
    %c0_31 = arith.constant 0 : index
    %50 = vector.load %arg3[%c96_30, %c0_31] : memref<162x128xf32, #tpu.memory_space<vmem>>, vector<16x128xf32>
    %c112 = arith.constant 112 : index
    %c0_32 = arith.constant 0 : index
    %51 = vector.load %arg3[%c112, %c0_32] : memref<162x128xf32, #tpu.memory_space<vmem>>, vector<16x128xf32>
    %52 = tpu.concatenate %50, %50 in 0 : vector<16x128xf32>, vector<16x128xf32> -> vector<32x128xf32>
    %53 = tpu.concatenate %51, %51 in 0 : vector<16x128xf32>, vector<16x128xf32> -> vector<32x128xf32>
    %54 = arith.mulf %49, %52 : vector<32x128xf32>
    %55 = arith.addf %54, %53 : vector<32x128xf32>
    %cst_33 = arith.constant 0.000000e+00 : f32
    %56 = vector.broadcast %cst_33 : f32 to vector<32x128xf32>
    %57 = arith.maximumf %55, %56 : vector<32x128xf32>
    %58 = arith.truncf %57 : vector<32x128xf32> to vector<32x128xbf16>
    %c512 = arith.constant 512 : index
    %c0_34 = arith.constant 0 : index
    %59 = vector.load %arg2[%c512, %c0_34] : memref<768x128xbf16, #tpu.memory_space<vmem>>, vector<128x128xbf16>
    %cst_35 = arith.constant dense<0.000000e+00> : vector<32x128xf32>
    %60 = tpu.matmul %58, %59, %cst_35 {dimension_numbers = #tpu.dot_dimension_numbers<[1], [0], [0], [1], [0, 0, 1, 1], [], []>} : vector<32x128xbf16>, vector<128x128xbf16>, vector<32x128xf32> -> vector<32x128xf32>
    %c128_36 = arith.constant 128 : index
    %c0_37 = arith.constant 0 : index
    %61 = vector.load %arg1[%c128_36, %c0_37] : memref<224x32xbf16, #tpu.memory_space<vmem>>, vector<32x32xbf16>
    %62 = arith.truncf %60 : vector<32x128xf32> to vector<32x128xbf16>
    %cst_38 = arith.constant dense<0.000000e+00> : vector<32x128xf32>
    %63 = tpu.matmul %61, %62, %cst_38 {dimension_numbers = #tpu.dot_dimension_numbers<[1], [0], [0], [1], [0, 0, 1, 1], [], []>} : vector<32x32xbf16>, vector<32x128xbf16>, vector<32x128xf32> -> vector<32x128xf32>
    %c128_39 = arith.constant 128 : index
    %c0_40 = arith.constant 0 : index
    %64 = vector.load %arg3[%c128_39, %c0_40] : memref<162x128xf32, #tpu.memory_space<vmem>>, vector<16x128xf32>
    %c144 = arith.constant 144 : index
    %c0_41 = arith.constant 0 : index
    %65 = vector.load %arg3[%c144, %c0_41] : memref<162x128xf32, #tpu.memory_space<vmem>>, vector<16x128xf32>
    %66 = tpu.concatenate %64, %64 in 0 : vector<16x128xf32>, vector<16x128xf32> -> vector<32x128xf32>
    %67 = tpu.concatenate %65, %65 in 0 : vector<16x128xf32>, vector<16x128xf32> -> vector<32x128xf32>
    %68 = arith.mulf %63, %66 : vector<32x128xf32>
    %69 = arith.addf %68, %67 : vector<32x128xf32>
    %cst_42 = arith.constant 0.000000e+00 : f32
    %70 = vector.broadcast %cst_42 : f32 to vector<32x128xf32>
    %71 = arith.maximumf %69, %70 : vector<32x128xf32>
    %72 = arith.addf %43, %71 : vector<32x128xf32>
    %73 = arith.truncf %72 : vector<32x128xf32> to vector<32x128xbf16>
    %c640 = arith.constant 640 : index
    %c0_43 = arith.constant 0 : index
    %74 = vector.load %arg2[%c640, %c0_43] : memref<768x128xbf16, #tpu.memory_space<vmem>>, vector<128x128xbf16>
    %cst_44 = arith.constant dense<0.000000e+00> : vector<32x128xf32>
    %75 = tpu.matmul %73, %74, %cst_44 {dimension_numbers = #tpu.dot_dimension_numbers<[1], [0], [0], [1], [0, 0, 1, 1], [], []>} : vector<32x128xbf16>, vector<128x128xbf16>, vector<32x128xf32> -> vector<32x128xf32>
    %c160 = arith.constant 160 : index
    %c0_45 = arith.constant 0 : index
    %76 = vector.load %arg1[%c160, %c0_45] : memref<224x32xbf16, #tpu.memory_space<vmem>>, vector<64x32xbf16>
    %77 = arith.truncf %75 : vector<32x128xf32> to vector<32x128xbf16>
    %cst_46 = arith.constant dense<0.000000e+00> : vector<64x128xf32>
    %78 = tpu.matmul %76, %77, %cst_46 {dimension_numbers = #tpu.dot_dimension_numbers<[1], [0], [0], [1], [0, 0, 1, 1], [], []>} : vector<64x32xbf16>, vector<32x128xbf16>, vector<64x128xf32> -> vector<64x128xf32>
    %c160_47 = arith.constant 160 : index
    %c0_48 = arith.constant 0 : index
    %79 = vector.load %arg3[%c160_47, %c0_48] : memref<162x128xf32, #tpu.memory_space<vmem>>, vector<1x128xf32>
    %c161 = arith.constant 161 : index
    %c0_49 = arith.constant 0 : index
    %80 = vector.load %arg3[%c161, %c0_49] : memref<162x128xf32, #tpu.memory_space<vmem>>, vector<1x128xf32>
    %81 = tpu.iota {dimensions = array<i32: 0>} : vector<64x128xi32>
    %c32_i32 = arith.constant 32 : i32
    %82 = vector.broadcast %c32_i32 : i32 to vector<64x128xi32>
    %83 = arith.cmpi slt, %81, %82 : vector<64x128xi32>
    %84 = vector.shape_cast %79 : vector<1x128xf32> to vector<1x128xf32>
    %85 = vector.broadcast %84 : vector<1x128xf32> to vector<64x128xf32>
    %86 = vector.shape_cast %80 : vector<1x128xf32> to vector<1x128xf32>
    %87 = vector.broadcast %86 : vector<1x128xf32> to vector<64x128xf32>
    %88 = arith.select %83, %85, %87 : vector<64x128xi1>, vector<64x128xf32>
    %89 = arith.addf %78, %88 : vector<64x128xf32>
    %90 = arith.negf %89 : vector<64x128xf32>
    %91 = math.exp %90 : vector<64x128xf32>
    %cst_50 = arith.constant 1.000000e+00 : f32
    %92 = vector.broadcast %cst_50 : f32 to vector<64x128xf32>
    %93 = arith.addf %92, %91 : vector<64x128xf32>
    %94 = arith.divf %92, %93 : vector<64x128xf32>
    %95 = arith.select %83, %89, %94 : vector<64x128xi1>, vector<64x128xf32>
    %c0_51 = arith.constant 0 : index
    %c0_52 = arith.constant 0 : index
    %96 = vector.load %arg4[%c0_51, %c0_52] : memref<64x128xf32, #tpu.memory_space<vmem>>, vector<64x128xf32>
    tpu.vector_store %arg4[%c0_51, %c0_52], %95 {strides = array<i32>} : memref<64x128xf32, #tpu.memory_space<vmem>>, vector<64x128xf32>,
    return
  }
}

</mosaic_0001>

<bundles_post_ra>
// kernel: fwd.1
= control target key start
LH: loop header
LB: loop body
LE: loop exit
PB: predicated region body
PF: predicated region fallthrough
CT: control target
= control target key end

     0   :  { %9 = vsyncpa [#allocation3], 0  ;;  %s1830_s15 = smov [#allocation2]   ;;  %s2072_s0 = inlined_call_operand.vmem [shape: f32[32,128], index: 0, kind: input, shape index: {}]   ;;  %s2073_s1 = inlined_call_operand.vmem [shape: bf16[224,32], index: 1, kind: input, shape index: {}]   ;;  %s2074_s2 = inlined_call_operand.hbm [shape: bf16[768,128], index: 2, kind: input, shape index: {}]   ;;  %s2075_s3 = inlined_call_operand.vmem [shape: f32[162,128], index: 3, kind: input, shape index: {}]   ;;  %s2076_s4 = inlined_call_operand.vmem [shape: f32[64,128], index: 4, kind: output, shape index: {}]  }
   0x1   :  { %s19_s16 = sshll.u32 %s1830_s15, 4  ;;  %s1806_s19 = scalar_lea.hbm %s2074_s2, 6144  ;;  %s20_s16 = int_to_ptr.vmem [resolvable:$true] %s19_s16 }
   0x2   :  { %p1807_p0 = scmp.ne.s32.totalorder %s2074_s2, %s1806_s19  ;;  %p1810_p1 = scmp.lt.u32.totalorder %s1806_s19, %s2074_s2 }
   0x4   :  { %p1812_p2 = pnand %p1810_p1, %p1807_p0 }
   0x6   :  { %1815 = shalt.err (!%p1812_p2)
}
   0x7   :  { %s1816_s24 = scalar_lea.vmem %s20_s16, 6144  ;;  %p1821_p4 = scmp.lt.s32.totalorder %s20_s16, %s20_s16 }
   0x8   :  { %p1817_p3 = scmp.ne.s32.totalorder %s20_s16, %s1816_s24  ;;  %p1822_p5 = scmp.lt.s32.totalorder %s1816_s24, %s1816_s24 }
   0xa   :  { %p1823_p6 = por %p1822_p5, %p1821_p4 }
   0xc   :  { %p1824_p7 = pnand %p1823_p6, %p1817_p3 }
   0xe   :  { %1827 = shalt.err (!%p1824_p7)
}
   0xf   :  { %s1831_s25 = smov 64   ;;  %s1832_s26 = smov 4  }
  0x10   :  { %25 = dma.hbm_to_vmem [thread:$0]  %s2074_s2, 6144, %s20_s16, [#allocation3], %s1831_s25, %s1831_s25, %s1832_s26  }
  0x11   :  { %1828 = dma.done.wait [#allocation3], 6144  }
  0x12   :  { %1829 = vsyncadd [#allocation3], 4294961152  ;;  %v1728_v0 = vld [vmem:[#allocation2] sm:$0xff]   ;;  %v1729_v1 = vld [vmem:[#allocation2 + $0x8] sm:$0xff]   ;;  %vm167_vm0 = vcmask 261120  }
  0x13   :  { %1553 = vmatprep.subr.bf16.mxu0 %v1728_v0  ;;  %v1730_v2 = vld [vmem:[#allocation2 + $0x10] sm:$0xff]   ;;  %v1731_v3 = vld [vmem:[#allocation2 + $0x18] sm:$0xff]   ;;  %v32_v4 = vld [vmem:[%s2072_s0] sm:$0xff] }
  0x14   :  { %1554 = vmatpush3.bf16.msra.mxu0 %v1728_v0  ;;  %v33_v5 = vld [vmem:[%s2072_s0 + $0x8] sm:$0xff]  ;;  %v1732_v7 = vld [vmem:[#allocation2 + $0x20] sm:$0xff]   ;;  %v1734_v9 = vld [vmem:[#allocation2 + $0x30] sm:$0xff]  }
  0x15   :  { %1555 = vmatprep.subr.bf16.mxu0 %v1729_v1  ;;  %v36_v6 = vpack.c.bf16 %v33_v5, %v32_v4  ;;  %v1733_v8 = vld [vmem:[#allocation2 + $0x28] sm:$0xff]   ;;  %v1735_v10 = vld [vmem:[#allocation2 + $0x38] sm:$0xff]   ;;  %v34_v11 = vld [vmem:[%s2072_s0 + $0x10] sm:$0xff] }
  0x16   :  { %v35_v12 = vld [vmem:[%s2072_s0 + $0x18] sm:$0xff]  ;;  %v1736_v14 = vld [vmem:[%s2073_s1] sm:$0xff]   ;;  %v1737_v22 = vld [vmem:[%s2073_s1 + $0x8] sm:$0xff]  }
  0x17   :  { %1569 = vmatprep.mubr.bf16.mxu0 %v36_v6  ;;  %v37_v13 = vpack.c.bf16 %v35_v12, %v34_v11  ;;  %1577 = vmatprep.mubr.msk.bf16.mxu1 %vm167_vm0, %v1736_v14  ;;  %v1738_v21 = vld [vmem:[#allocation2 + $0x40] sm:$0xff]   ;;  %v1739_v23 = vld [vmem:[#allocation2 + $0x48] sm:$0xff]   ;;  %v1740_v24 = vld [vmem:[#allocation2 + $0x50] sm:$0xff]  }
  0x18   :  { %1556 = vmatpush3.bf16.msra.mxu0 %v1729_v1  ;;  %v1741_v25 = vld [vmem:[#allocation2 + $0x58] sm:$0xff]   ;;  %v1742_v26 = vld [vmem:[#allocation2 + $0x60] sm:$0xff]   ;;  %v1743_v27 = vld [vmem:[#allocation2 + $0x68] sm:$0xff]  }
  0x19   :  { %1557 = vmatprep.subr.bf16.mxu0 %v1730_v2  ;;  %v1744_v28 = vld [vmem:[#allocation2 + $0x70] sm:$0xff]   ;;  %v1745_v29 = vld [vmem:[#allocation2 + $0x78] sm:$0xff]   ;;  %v223_v30 = vld [vmem:[%s2075_s3] sm:$0xff] }
  0x1a   :  { %v224_v32 = vld [vmem:[%s2075_s3 + $0x8] sm:$0xff]  ;;  %v225_v33 = vld [vmem:[%s2075_s3 + $0x10] sm:$0xff]  ;;  %v226_v38 = vld [vmem:[%s2075_s3 + $0x18] sm:$0xff] }
  0x1b   :  { %v1746_v52 = vld [vmem:[%s2073_s1 + $0x10] sm:$0xff]   ;;  %v1748_v59 = vld [vmem:[#allocation2 + $0x80] sm:$0xff]   ;;  %v1747_v60 = vld [vmem:[%s2073_s1 + $0x18] sm:$0xff]  }
  0x1c   :  { %1558 = vmatpush3.bf16.msra.mxu0 %v1730_v2  ;;  %v1749_v61 = vld [vmem:[#allocation2 + $0x88] sm:$0xff]   ;;  %v1750_v62 = vld [vmem:[#allocation2 + $0x90] sm:$0xff]   ;;  %v1751_v63 = vld [vmem:[#allocation2 + $0x98] sm:$0xff]  }
  0x1d   :  { %1559 = vmatprep.subr.bf16.mxu0 %v1731_v3  ;;  %v1752_v0 = vld [vmem:[#allocation2 + $0xa0] sm:$0xff]   ;;  %v1753_v1 = vld [vmem:[#allocation2 + $0xa8] sm:$0xff]   ;;  %v1754_v2 = vld [vmem:[#allocation2 + $0xb0] sm:$0xff]  }
  0x1e   :  { %v425_v4 = vld [vmem:[%s2075_s3 + $0x20] sm:$0xff]  ;;  %v427_v6 = vld [vmem:[%s2075_s3 + $0x30] sm:$0xff]  ;;  %v428_v12 = vld [vmem:[%s2075_s3 + $0x38] sm:$0xff] }
  0x20   :  { %1560 = vmatpush3.bf16.msra.mxu0 %v1731_v3  ;;  %v1755_v3 = vld [vmem:[#allocation2 + $0xb8] sm:$0xff]  }
  0x21   :  { %1561 = vmatprep.subr.bf16.mxu0 %v1732_v7 }
  0x24   :  { %1562 = vmatpush3.bf16.msra.mxu0 %v1732_v7  ;;  %v426_v7 = vld [vmem:[%s2075_s3 + $0x28] sm:$0xff] }
  0x25   :  { %1563 = vmatprep.subr.bf16.mxu0 %v1733_v8 }
  0x28   :  { %1564 = vmatpush3.bf16.msra.mxu0 %v1733_v8 }
  0x29   :  { %1565 = vmatprep.subr.bf16.mxu0 %v1734_v9 }
  0x2c   :  { %1566 = vmatpush3.bf16.msra.mxu0 %v1734_v9 }
  0x2d   :  { %1567 = vmatprep.subr.bf16.mxu0 %v1735_v10 }
  0x30   :  { %1568 = vmatpush3.bf16.msra.mxu0 %v1735_v10 }
  0x33   :  { %1570 = vmatmul.mubr.bf16.vlgmr.msra.gmra.mrb[0].mxu0 %v37_v13 }
  0x34   :  { %1605 = vmatprep.mubr.msk.bf16.mxu0 %vm167_vm0, %v1746_v52  ;;  %v629_v52 = vld [vmem:[%s2075_s3 + $0x50] sm:$0xff] }
 0x106   :  { %v1571_v15 = vpop.f32.mrb[0].mxu0 }
 0x107   :  { %v136_v16 = vpop.f32.mrb[1].mxu0 }
 0x108   :  { %v1572_v17 = vpop.f32.mrb[2].mxu0 }
 0x109   :  { %v156_v18 = vpack.c.bf16 %v1572_v17, %v1571_v15  ;;  %v139_v19 = vpop.f32.mrb[3].mxu0 }
 0x10a   :  { %v155_v20 = vpack.c.bf16 %v139_v19, %v136_v16 }
 0x10c   :  { %1573 = vmatprep.subr.bf16.mxu1 %v155_v20 }
 0x10d   :  { %1574 = vmatpush3.bf16.msra.mxu1 %v155_v20 }
 0x10e   :  { %1575 = vmatprep.subr.bf16.mxu1 %v156_v18 }
 0x111   :  { %1576 = vmatpush3.bf16.msra.mxu1 %v156_v18 }
 0x112   :  { %1581 = vmatprep.subr.bf16.mxu1 %v1738_v21 }
 0x114   :  { %1578 = vmatmul.mubr.msk.bf16.vlgmr.msra.gmra.mrb[0].mxu1 %vm167_vm0, %v1737_v22 }
 0x115   :  { %1582 = vmatpush3.bf16.msra.mxu1 %v1738_v21 }
 0x116   :  { %1583 = vmatprep.subr.bf16.mxu1 %v1739_v23 }
 0x119   :  { %1584 = vmatpush3.bf16.msra.mxu1 %v1739_v23 }
 0x11a   :  { %1585 = vmatprep.subr.bf16.mxu1 %v1740_v24 }
 0x11d   :  { %1586 = vmatpush3.bf16.msra.mxu1 %v1740_v24 }
 0x11e   :  { %1587 = vmatprep.subr.bf16.mxu1 %v1741_v25 }
 0x121   :  { %1588 = vmatpush3.bf16.msra.mxu1 %v1741_v25 }
 0x122   :  { %1589 = vmatprep.subr.bf16.mxu1 %v1742_v26 }
 0x125   :  { %1590 = vmatpush3.bf16.msra.mxu1 %v1742_v26  ;;  %v1756_v26 = vld [vmem:[%s2073_s1 + $0x20] sm:$0xff]  }
 0x126   :  { %1591 = vmatprep.subr.bf16.mxu1 %v1743_v27 }
 0x129   :  { %1592 = vmatpush3.bf16.msra.mxu1 %v1743_v27 }
 0x12a   :  { %1593 = vmatprep.subr.bf16.mxu1 %v1744_v28 }
 0x12d   :  { %1594 = vmatpush3.bf16.msra.mxu1 %v1744_v28 }
 0x12e   :  { %1595 = vmatprep.subr.bf16.mxu1 %v1745_v29 }
 0x131   :  { %1596 = vmatpush3.bf16.msra.mxu1 %v1745_v29 }
 0x1e7   :  { %v1579_v31 = vpop.f32.mrb[0].mxu1 }
 0x1e8   :  { %v229_v34 = vmul.f32 %v1579_v31, %v223_v30  ;;  %v208_v35 = vpop.f32.mrb[1].mxu1 }
 0x1e9   :  { %v227_v36 = vmul.f32 %v223_v30, %v208_v35  ;;  %v1580_v37 = vpop.f32.mrb[2].mxu1  ;;  %v1759_v35 = vld [vmem:[#allocation2 + $0xc8] sm:$0xff]  }
 0x1ea   :  { %v230_v39 = vmul.f32 %v1580_v37, %v224_v32  ;;  %v211_v40 = vpop.f32.mrb[3].mxu1  ;;  %v1904_v43 = vadd.f32 %v229_v34, %v225_v33  ;;  %v1757_v34 = vld [vmem:[%s2073_s1 + $0x28] sm:$0xff]   ;;  %v1761_v37 = vld [vmem:[#allocation2 + $0xd8] sm:$0xff]  }
 0x1eb   :  { %v1902_v41 = vadd.f32 %v227_v36, %v225_v33  ;;  %v228_v42 = vmul.f32 %v224_v32, %v211_v40  ;;  %v1758_v33 = vld [vmem:[#allocation2 + $0xc0] sm:$0xff]   ;;  %v1760_v36 = vld [vmem:[#allocation2 + $0xd0] sm:$0xff]  }
 0x1ec   :  { %v1906_v44 = vadd.f32 %v230_v39, %v226_v38  ;;  %v237_v49 = vmax.f32 %v1904_v43, 0.0  ;;  %v1763_v39 = vld [vmem:[#allocation2 + $0xe8] sm:$0xff]   ;;  %v1764_v40 = vld [vmem:[#allocation2 + $0xf0] sm:$0xff]  }
 0x1ed   :  { %v1908_v45 = vadd.f32 %v228_v42, %v226_v38  ;;  %v235_v47 = vmax.f32 %v1902_v41, 0.0  ;;  %v1762_v38 = vld [vmem:[#allocation2 + $0xe0] sm:$0xff]   ;;  %v1765_v42 = vld [vmem:[#allocation2 + $0xf8] sm:$0xff]   ;;  %v1766_v41 = vld [vmem:[%s2073_s1 + $0x30] sm:$0xff]  }
 0x1ee   :  { %v238_v46 = vmax.f32 %v1906_v44, 0.0 }
 0x1ef   :  { %v236_v48 = vmax.f32 %v1908_v45, 0.0 }
 0x1f0   :  { %v240_v51 = vpack.c.bf16 %v238_v46, %v237_v49 }
 0x1f1   :  { %v239_v50 = vpack.c.bf16 %v236_v48, %v235_v47 }
 0x1f3   :  { %1597 = vmatprep.mubr.bf16.mxu1 %v239_v50  ;;  %v627_v50 = vld [vmem:[%s2075_s3 + $0x40] sm:$0xff] }
 0x1f4   :  { %1598 = vmatmul.mubr.bf16.vlgmr.msra.gmra.mrb[4].mxu1 %v240_v51 }
 0x1f5   :  { %1633 = vmatprep.mubr.msk.bf16.mxu1 %vm167_vm0, %v1756_v26 }
 0x2c7   :  { %v1599_v53 = vpop.f32.mrb[4].mxu1 }
 0x2c8   :  { %v339_v54 = vpop.f32.mrb[5].mxu1 }
 0x2c9   :  { %v1600_v55 = vpop.f32.mrb[6].mxu1 }
 0x2ca   :  { %v359_v56 = vpack.c.bf16 %v1600_v55, %v1599_v53  ;;  %v342_v57 = vpop.f32.mrb[7].mxu1  ;;  %v628_v53 = vld [vmem:[%s2075_s3 + $0x48] sm:$0xff] }
 0x2cb   :  { %v358_v58 = vpack.c.bf16 %v342_v57, %v339_v54 }
 0x2cd   :  { %1601 = vmatprep.subr.bf16.mxu0 %v358_v58 }
 0x2ce   :  { %1602 = vmatpush3.bf16.msra.mxu0 %v358_v58  ;;  %v630_v58 = vld [vmem:[%s2075_s3 + $0x58] sm:$0xff] }
 0x2cf   :  { %1603 = vmatprep.subr.bf16.mxu0 %v359_v56 }
 0x2d2   :  { %1604 = vmatpush3.bf16.msra.mxu0 %v359_v56 }
 0x2d3   :  { %1609 = vmatprep.subr.bf16.mxu0 %v1748_v59 }
 0x2d5   :  { %1606 = vmatmul.mubr.msk.bf16.vlgmr.msra.gmra.mrb[4].mxu0 %vm167_vm0, %v1747_v60 }
 0x2d6   :  { %1610 = vmatpush3.bf16.msra.mxu0 %v1748_v59 }
 0x2d7   :  { %1611 = vmatprep.subr.bf16.mxu0 %v1749_v61 }
 0x2da   :  { %1612 = vmatpush3.bf16.msra.mxu0 %v1749_v61 }
 0x2db   :  { %1613 = vmatprep.subr.bf16.mxu0 %v1750_v62 }
 0x2de   :  { %1614 = vmatpush3.bf16.msra.mxu0 %v1750_v62 }
 0x2df   :  { %1615 = vmatprep.subr.bf16.mxu0 %v1751_v63 }
 0x2e2   :  { %1616 = vmatpush3.bf16.msra.mxu0 %v1751_v63 }
 0x2e3   :  { %1617 = vmatprep.subr.bf16.mxu0 %v1752_v0 }
 0x2e6   :  { %1618 = vmatpush3.bf16.msra.mxu0 %v1752_v0 }
 0x2e7   :  { %1619 = vmatprep.subr.bf16.mxu0 %v1753_v1 }
 0x2ea   :  { %1620 = vmatpush3.bf16.msra.mxu0 %v1753_v1 }
 0x2eb   :  { %1621 = vmatprep.subr.bf16.mxu0 %v1754_v2 }
 0x2ee   :  { %1622 = vmatpush3.bf16.msra.mxu0 %v1754_v2 }
 0x2ef   :  { %1623 = vmatprep.subr.bf16.mxu0 %v1755_v3 }
 0x2f2   :  { %1624 = vmatpush3.bf16.msra.mxu0 %v1755_v3 }
 0x3a8   :  { %v1607_v5 = vpop.f32.mrb[4].mxu0 }
 0x3a9   :  { %v431_v8 = vmul.f32 %v1607_v5, %v425_v4  ;;  %v410_v9 = vpop.f32.mrb[5].mxu0 }
 0x3aa   :  { %v429_v10 = vmul.f32 %v425_v4, %v410_v9  ;;  %v1608_v11 = vpop.f32.mrb[6].mxu0 }
 0x3ab   :  { %v435_v13 = vadd.f32 %v431_v8, %v427_v6  ;;  %v432_v14 = vmul.f32 %v1608_v11, %v426_v7  ;;  %v413_v15 = vpop.f32.mrb[7].mxu0  ;;  %v1768_v11 = vld [vmem:[#allocation2 + $0x100] sm:$0xff]  }
 0x3ac   :  { %v433_v16 = vadd.f32 %v429_v10, %v427_v6  ;;  %v430_v17 = vmul.f32 %v426_v7, %v413_v15  ;;  %v1771_v15 = vld [vmem:[#allocation2 + $0x118] sm:$0xff]  }
 0x3ad   :  { %v436_v18 = vadd.f32 %v432_v14, %v428_v12  ;;  %v439_v20 = vmax.f32 %v435_v13, 0.0  ;;  %v1769_v13 = vld [vmem:[#allocation2 + $0x108] sm:$0xff]   ;;  %v1770_v14 = vld [vmem:[#allocation2 + $0x110] sm:$0xff]  }
 0x3ae   :  { %v434_v19 = vadd.f32 %v430_v17, %v428_v12  ;;  %v437_v22 = vmax.f32 %v433_v16, 0.0  ;;  %v1767_v12 = vld [vmem:[%s2073_s1 + $0x38] sm:$0xff]   ;;  %v1772_v16 = vld [vmem:[#allocation2 + $0x120] sm:$0xff]   ;;  %v1773_v17 = vld [vmem:[#allocation2 + $0x128] sm:$0xff]  }
 0x3af   :  { %v440_v21 = vmax.f32 %v436_v18, 0.0  ;;  %v1774_v18 = vld [vmem:[#allocation2 + $0x130] sm:$0xff]  }
 0x3b0   :  { %v438_v23 = vmax.f32 %v434_v19, 0.0  ;;  %v1775_v19 = vld [vmem:[#allocation2 + $0x138] sm:$0xff]  }
 0x3b1   :  { %v442_v24 = vpack.c.bf16 %v440_v21, %v439_v20  ;;  %v833_v20 = vld [vmem:[%s2075_s3 + $0x60] sm:$0xff] }
 0x3b2   :  { %v441_v25 = vpack.c.bf16 %v438_v23, %v437_v22  ;;  %v835_v22 = vld [vmem:[%s2075_s3 + $0x70] sm:$0xff]  ;;  %v834_v23 = vld [vmem:[%s2075_s3 + $0x68] sm:$0xff] }
 0x3b4   :  { %1625 = vmatprep.mubr.bf16.mxu0 %v441_v25 }
 0x3b5   :  { %1626 = vmatmul.mubr.bf16.vlgmr.msra.gmra.mrb[8].mxu0 %v442_v24 }
 0x3b6   :  { %1661 = vmatprep.mubr.msk.bf16.mxu0 %vm167_vm0, %v1766_v41 }
 0x488   :  { %v1627_v27 = vpop.f32.mrb[8].mxu0 }
 0x489   :  { %v541_v28 = vpop.f32.mrb[9].mxu0 }
 0x48a   :  { %v1628_v29 = vpop.f32.mrb[10].mxu0 }
 0x48b   :  { %v561_v30 = vpack.c.bf16 %v1628_v29, %v1627_v27  ;;  %v544_v31 = vpop.f32.mrb[11].mxu0 }
 0x48c   :  { %v560_v32 = vpack.c.bf16 %v544_v31, %v541_v28  ;;  %v836_v28 = vld [vmem:[%s2075_s3 + $0x78] sm:$0xff] }
 0x48e   :  { %1629 = vmatprep.subr.bf16.mxu1 %v560_v32 }
 0x48f   :  { %1630 = vmatpush3.bf16.msra.mxu1 %v560_v32 }
 0x490   :  { %1631 = vmatprep.subr.bf16.mxu1 %v561_v30 }
 0x493   :  { %1632 = vmatpush3.bf16.msra.mxu1 %v561_v30 }
 0x494   :  { %1637 = vmatprep.subr.bf16.mxu1 %v1758_v33 }
 0x496   :  { %1634 = vmatmul.mubr.msk.bf16.vlgmr.msra.gmra.mrb[8].mxu1 %vm167_vm0, %v1757_v34 }
 0x497   :  { %1638 = vmatpush3.bf16.msra.mxu1 %v1758_v33 }
 0x498   :  { %1639 = vmatprep.subr.bf16.mxu1 %v1759_v35 }
 0x49b   :  { %1640 = vmatpush3.bf16.msra.mxu1 %v1759_v35 }
 0x49c   :  { %1641 = vmatprep.subr.bf16.mxu1 %v1760_v36 }
 0x49f   :  { %1642 = vmatpush3.bf16.msra.mxu1 %v1760_v36 }
 0x4a0   :  { %1643 = vmatprep.subr.bf16.mxu1 %v1761_v37 }
 0x4a3   :  { %1644 = vmatpush3.bf16.msra.mxu1 %v1761_v37 }
 0x4a4   :  { %1645 = vmatprep.subr.bf16.mxu1 %v1762_v38 }
 0x4a7   :  { %1646 = vmatpush3.bf16.msra.mxu1 %v1762_v38 }
 0x4a8   :  { %1647 = vmatprep.subr.bf16.mxu1 %v1763_v39 }
 0x4ab   :  { %1648 = vmatpush3.bf16.msra.mxu1 %v1763_v39 }
 0x4ac   :  { %1649 = vmatprep.subr.bf16.mxu1 %v1764_v40 }
 0x4af   :  { %1650 = vmatpush3.bf16.msra.mxu1 %v1764_v40 }
 0x4b0   :  { %1651 = vmatprep.subr.bf16.mxu1 %v1765_v42 }
 0x4b3   :  { %1652 = vmatpush3.bf16.msra.mxu1 %v1765_v42 }
 0x569   :  { %v1635_v51 = vpop.f32.mrb[8].mxu1 }
 0x56a   :  { %v633_v54 = vmul.f32 %v1635_v51, %v627_v50  ;;  %v612_v55 = vpop.f32.mrb[9].mxu1 }
 0x56b   :  { %v631_v56 = vmul.f32 %v627_v50, %v612_v55  ;;  %v1636_v57 = vpop.f32.mrb[10].mxu1  ;;  %v1776_v50 = vld [vmem:[%s2073_s1 + $0x40] sm:$0xff]  }
 0x56c   :  { %v637_v59 = vadd.f32 %v633_v54, %v629_v52  ;;  %v634_v60 = vmul.f32 %v1636_v57, %v628_v53  ;;  %v615_v61 = vpop.f32.mrb[11].mxu1  ;;  %v1778_v57 = vld [vmem:[#allocation2 + $0x140] sm:$0xff]  }
 0x56d   :  { %v635_v62 = vadd.f32 %v631_v56, %v629_v52  ;;  %v632_v63 = vmul.f32 %v628_v53, %v615_v61  ;;  %v1781_v61 = vld [vmem:[#allocation2 + $0x158] sm:$0xff]  }
 0x56e   :  { %v638_v0 = vadd.f32 %v634_v60, %v630_v58  ;;  %v641_v3 = vmax.f32 %v637_v59, 0.0  ;;  %v1779_v59 = vld [vmem:[#allocation2 + $0x148] sm:$0xff]   ;;  %v1780_v60 = vld [vmem:[#allocation2 + $0x150] sm:$0xff]  }
 0x56f   :  { %v639_v1 = vmax.f32 %v635_v62, 0.0  ;;  %v636_v2 = vadd.f32 %v632_v63, %v630_v58  ;;  %v1777_v58 = vld [vmem:[%s2073_s1 + $0x48] sm:$0xff]   ;;  %v1782_v62 = vld [vmem:[#allocation2 + $0x160] sm:$0xff]  }
 0x570   :  { %v642_v4 = vmax.f32 %v638_v0, 0.0  ;;  %v1976_v9 = vadd.f32 %v641_v3, %v237_v49  ;;  %v1783_v63 = vld [vmem:[#allocation2 + $0x168] sm:$0xff]   ;;  %v1784_v0 = vld [vmem:[#allocation2 + $0x170] sm:$0xff]  }
 0x571   :  { %v640_v5 = vmax.f32 %v636_v2, 0.0  ;;  %v1968_v7 = vadd.f32 %v639_v1, %v235_v47  ;;  %v1785_v1 = vld [vmem:[#allocation2 + $0x178] sm:$0xff]   ;;  %v1035_v2 = vld [vmem:[%s2075_s3 + $0x80] sm:$0xff] }
 0x572   :  { %v1964_v6 = vadd.f32 %v642_v4, %v238_v46  ;;  %v1037_v4 = vld [vmem:[%s2075_s3 + $0x90] sm:$0xff] }
 0x573   :  { %v1972_v8 = vadd.f32 %v640_v5, %v236_v48  ;;  %v1036_v5 = vld [vmem:[%s2075_s3 + $0x88] sm:$0xff] }
 0x574   :  { %v648_v44 = vpack.c.bf16 %v1964_v6, %v1976_v9 }
 0x575   :  { %v647_v10 = vpack.c.bf16 %v1972_v8, %v1968_v7 }
 0x577   :  { %1653 = vmatprep.mubr.bf16.mxu1 %v647_v10 }
 0x578   :  { %1654 = vmatmul.mubr.bf16.vlgmr.msra.gmra.mrb[12].mxu1 %v648_v44 }
 0x579   :  { %1689 = vmatprep.mubr.msk.bf16.mxu1 %vm167_vm0, %v1776_v50 }
 0x64b   :  { %v1655_v45 = vpop.f32.mrb[12].mxu1 }
 0x64c   :  { %v747_v46 = vpop.f32.mrb[13].mxu1 }
 0x64d   :  { %v1656_v47 = vpop.f32.mrb[14].mxu1 }
 0x64e   :  { %v767_v43 = vpack.c.bf16 %v1656_v47, %v1655_v45  ;;  %v750_v48 = vpop.f32.mrb[15].mxu1 }
 0x64f   :  { %v766_v49 = vpack.c.bf16 %v750_v48, %v747_v46  ;;  %v1038_v46 = vld [vmem:[%s2075_s3 + $0x98] sm:$0xff] }
 0x651   :  { %1657 = vmatprep.subr.bf16.mxu0 %v766_v49 }
 0x652   :  { %1658 = vmatpush3.bf16.msra.mxu0 %v766_v49 }
 0x653   :  { %1659 = vmatprep.subr.bf16.mxu0 %v767_v43 }
 0x656   :  { %1660 = vmatpush3.bf16.msra.mxu0 %v767_v43 }
 0x657   :  { %1665 = vmatprep.subr.bf16.mxu0 %v1768_v11 }
 0x659   :  { %1662 = vmatmul.mubr.msk.bf16.vlgmr.msra.gmra.mrb[12].mxu0 %vm167_vm0, %v1767_v12 }
 0x65a   :  { %1666 = vmatpush3.bf16.msra.mxu0 %v1768_v11 }
 0x65b   :  { %1667 = vmatprep.subr.bf16.mxu0 %v1769_v13 }
 0x65e   :  { %1668 = vmatpush3.bf16.msra.mxu0 %v1769_v13 }
 0x65f   :  { %1669 = vmatprep.subr.bf16.mxu0 %v1770_v14 }
 0x662   :  { %1670 = vmatpush3.bf16.msra.mxu0 %v1770_v14 }
 0x663   :  { %1671 = vmatprep.subr.bf16.mxu0 %v1771_v15 }
 0x666   :  { %1672 = vmatpush3.bf16.msra.mxu0 %v1771_v15 }
 0x667   :  { %1673 = vmatprep.subr.bf16.mxu0 %v1772_v16 }
 0x66a   :  { %1674 = vmatpush3.bf16.msra.mxu0 %v1772_v16 }
 0x66b   :  { %1675 = vmatprep.subr.bf16.mxu0 %v1773_v17 }
 0x66e   :  { %1676 = vmatpush3.bf16.msra.mxu0 %v1773_v17 }
 0x66f   :  { %1677 = vmatprep.subr.bf16.mxu0 %v1774_v18 }
 0x672   :  { %1678 = vmatpush3.bf16.msra.mxu0 %v1774_v18 }
 0x673   :  { %1679 = vmatprep.subr.bf16.mxu0 %v1775_v19 }
 0x676   :  { %1680 = vmatpush3.bf16.msra.mxu0 %v1775_v19 }
 0x72c   :  { %v1663_v21 = vpop.f32.mrb[12].mxu0 }
 0x72d   :  { %v839_v24 = vmul.f32 %v1663_v21, %v833_v20  ;;  %v818_v25 = vpop.f32.mrb[13].mxu0 }
 0x72e   :  { %v837_v26 = vmul.f32 %v833_v20, %v818_v25  ;;  %v1664_v27 = vpop.f32.mrb[14].mxu0 }
 0x72f   :  { %v843_v29 = vadd.f32 %v839_v24, %v835_v22  ;;  %v840_v30 = vmul.f32 %v1664_v27, %v834_v23  ;;  %v821_v31 = vpop.f32.mrb[15].mxu0  ;;  %v1786_v24 = vld [vmem:[%s2073_s1 + $0x50] sm:$0xff]  }
 0x730   :  { %v841_v32 = vadd.f32 %v837_v26, %v835_v22  ;;  %v838_v33 = vmul.f32 %v834_v23, %v821_v31 }
 0x731   :  { %v844_v34 = vadd.f32 %v840_v30, %v836_v28  ;;  %v847_v36 = vmax.f32 %v843_v29, 0.0  ;;  %v1789_v29 = vld [vmem:[%s2073_s1 + $0x68] sm:$0xff]   ;;  %v1449_v30 = vld [vmem:[%s2075_s3 + $0xa0] ss:$0 sm:$0xff] }
 0x732   :  { %v842_v35 = vadd.f32 %v838_v33, %v836_v28  ;;  %v845_v38 = vmax.f32 %v841_v32, 0.0 }
 0x733   :  { %v848_v37 = vmax.f32 %v844_v34, 0.0 }
 0x734   :  { %v846_v39 = vmax.f32 %v842_v35, 0.0 }
 0x735   :  { %v850_v40 = vpack.c.bf16 %v848_v37, %v847_v36 }
 0x736   :  { %v849_v42 = vpack.c.bf16 %v846_v39, %v845_v38  ;;  %v1450_v39 = vld [vmem:[%s2075_s3 + $0xa1] ss:$0 sm:$0xff] }
 0x738   :  { %1681 = vmatprep.mubr.bf16.mxu0 %v849_v42 }
 0x739   :  { %1682 = vmatmul.mubr.bf16.vlgmr.msra.gmra.mrb[16].mxu0 %v850_v40 }
 0x73a   :  { %1717 = vmatprep.mubr.msk.bf16.mxu0 %vm167_vm0, %v1786_v24 }
 0x80c   :  { %v1683_v51 = vpop.f32.mrb[16].mxu0 }
 0x80d   :  { %v949_v52 = vpop.f32.mrb[17].mxu0 }
 0x80e   :  { %v1684_v53 = vpop.f32.mrb[18].mxu0 }
 0x80f   :  { %v969_v54 = vpack.c.bf16 %v1684_v53, %v1683_v51  ;;  %v952_v55 = vpop.f32.mrb[19].mxu0 }
 0x810   :  { %v968_v56 = vpack.c.bf16 %v952_v55, %v949_v52 }
 0x812   :  { %1685 = vmatprep.subr.bf16.mxu1 %v968_v56 }
 0x813   :  { %1686 = vmatpush3.bf16.msra.mxu1 %v968_v56 }
 0x814   :  { %1687 = vmatprep.subr.bf16.mxu1 %v969_v54 }
 0x817   :  { %1688 = vmatpush3.bf16.msra.mxu1 %v969_v54 }
 0x818   :  { %1693 = vmatprep.subr.bf16.mxu1 %v1778_v57 }
 0x81a   :  { %1690 = vmatmul.mubr.msk.bf16.vlgmr.msra.gmra.mrb[16].mxu1 %vm167_vm0, %v1777_v58 }
 0x81b   :  { %1694 = vmatpush3.bf16.msra.mxu1 %v1778_v57 }
 0x81c   :  { %1695 = vmatprep.subr.bf16.mxu1 %v1779_v59 }
 0x81f   :  { %1696 = vmatpush3.bf16.msra.mxu1 %v1779_v59 }
 0x820   :  { %1697 = vmatprep.subr.bf16.mxu1 %v1780_v60 }
 0x823   :  { %1698 = vmatpush3.bf16.msra.mxu1 %v1780_v60 }
 0x824   :  { %1699 = vmatprep.subr.bf16.mxu1 %v1781_v61 }
 0x827   :  { %1700 = vmatpush3.bf16.msra.mxu1 %v1781_v61 }
 0x828   :  { %1701 = vmatprep.subr.bf16.mxu1 %v1782_v62 }
 0x82b   :  { %1702 = vmatpush3.bf16.msra.mxu1 %v1782_v62 }
 0x82c   :  { %1703 = vmatprep.subr.bf16.mxu1 %v1783_v63 }
 0x82f   :  { %1704 = vmatpush3.bf16.msra.mxu1 %v1783_v63 }
 0x830   :  { %1705 = vmatprep.subr.bf16.mxu1 %v1784_v0 }
 0x833   :  { %1706 = vmatpush3.bf16.msra.mxu1 %v1784_v0 }
 0x834   :  { %1707 = vmatprep.subr.bf16.mxu1 %v1785_v1 }
 0x837   :  { %1708 = vmatpush3.bf16.msra.mxu1 %v1785_v1 }
 0x8ed   :  { %v1691_v3 = vpop.f32.mrb[16].mxu1 }
 0x8ee   :  { %v1041_v10 = vmul.f32 %v1691_v3, %v1035_v2  ;;  %v1020_v44 = vpop.f32.mrb[17].mxu1 }
 0x8ef   :  { %v1039_v41 = vmul.f32 %v1035_v2, %v1020_v44  ;;  %v1692_v45 = vpop.f32.mrb[18].mxu1 }
 0x8f0   :  { %v1045_v47 = vadd.f32 %v1041_v10, %v1037_v4  ;;  %v1042_v43 = vmul.f32 %v1692_v45, %v1036_v5  ;;  %v1023_v48 = vpop.f32.mrb[19].mxu1 }
 0x8f1   :  { %v1043_v49 = vadd.f32 %v1039_v41, %v1037_v4  ;;  %v1040_v11 = vmul.f32 %v1036_v5, %v1023_v48 }
 0x8f2   :  { %v1049_v12 = vmax.f32 %v1045_v47, 0.0  ;;  %v1046_v13 = vadd.f32 %v1042_v43, %v1038_v46 }
 0x8f3   :  { %v1047_v14 = vmax.f32 %v1043_v49, 0.0  ;;  %v1044_v15 = vadd.f32 %v1040_v11, %v1038_v46 }
 0x8f4   :  { %v1050_v16 = vmax.f32 %v1046_v13, 0.0  ;;  %v1053_v18 = vadd.f32 %v1049_v12, %v1976_v9 }
 0x8f5   :  { %v1048_v17 = vmax.f32 %v1044_v15, 0.0  ;;  %v1051_v20 = vadd.f32 %v1047_v14, %v1968_v7  ;;  %v1787_v7 = vld [vmem:[%s2073_s1 + $0x58] sm:$0xff]  }
 0x8f6   :  { %v1054_v19 = vadd.f32 %v1050_v16, %v1964_v6 }
 0x8f7   :  { %v1052_v21 = vadd.f32 %v1048_v17, %v1972_v8  ;;  %v1788_v8 = vld [vmem:[%s2073_s1 + $0x60] sm:$0xff]  }
 0x8f8   :  { %v1056_v22 = vpack.c.bf16 %v1054_v19, %v1053_v18 }
 0x8f9   :  { %v1055_v23 = vpack.c.bf16 %v1052_v21, %v1051_v20 }
 0x8fb   :  { %1709 = vmatprep.mubr.bf16.mxu1 %v1055_v23 }
 0x8fc   :  { %1710 = vmatmul.mubr.bf16.vlgmr.msra.gmra.mrb[20].mxu1 %v1056_v22 }
 0x9cf   :  { %v1711_v25 = vpop.f32.mrb[20].mxu1 }
 0x9d0   :  { %v1155_v26 = vpop.f32.mrb[21].mxu1 }
 0x9d1   :  { %v1712_v27 = vpop.f32.mrb[22].mxu1 }
 0x9d2   :  { %v1179_v9 = vpack.c.bf16 %v1712_v27, %v1711_v25  ;;  %v1158_v28 = vpop.f32.mrb[23].mxu1 }
 0x9d3   :  { %v1178_v6 = vpack.c.bf16 %v1158_v28, %v1155_v26 }
 0x9d5   :  { %1713 = vmatprep.subr.bf16.mxu0 %v1178_v6 }
 0x9d6   :  { %1714 = vmatpush3.bf16.msra.mxu0 %v1178_v6 }
 0x9d7   :  { %1715 = vmatprep.subr.bf16.mxu0 %v1179_v9 }
 0x9da   :  { %1716 = vmatpush3.bf16.msra.mxu0 %v1179_v9 }
 0x9dd   :  { %1718 = vmatmul.mubr.msk.bf16.vlgmr.msra.gmra.mrb[20].mxu0 %vm167_vm0, %v1787_v7 }
 0x9de   :  { %1721 = vmatprep.mubr.msk.bf16.mxu0 %vm167_vm0, %v1788_v8 }
 0x9e5   :  { %1722 = vmatmul.mubr.msk.bf16.gmra.mrb[24].mxu0 %vm167_vm0, %v1789_v29 }
 0xab0   :  { %v1719_v31 = vpop.f32.mrb[20].mxu0 }
 0xab1   :  { %v1290_v32 = vadd.f32 %v1719_v31, %v1449_v30  ;;  %v1281_v33 = vpop.f32.mrb[21].mxu0 }
 0xab2   :  { %v1282_v34 = vadd.f32 %v1449_v30, %v1281_v33  ;;  %v1720_v35 = vpop.f32.mrb[22].mxu0 }
 0xab3   :  { %1370 = vst [vmem:[%s2076_s4 + $0x10] sm:$0xff] %v1290_v32  ;;  %v1293_v36 = vadd.f32 %v1720_v35, %v1449_v30  ;;  %v1284_v37 = vpop.f32.mrb[23].mxu0 }
 0xab4   :  { %1368 = vst [vmem:[%s2076_s4] sm:$0xff] %v1282_v34  ;;  %v1285_v38 = vadd.f32 %v1449_v30, %v1284_v37 }
 0xab5   :  { %1371 = vst [vmem:[%s2076_s4 + $0x18] sm:$0xff] %v1293_v36 }
 0xab6   :  { %1369 = vst [vmem:[%s2076_s4 + $0x8] sm:$0xff] %v1285_v38 }
 0xab8   :  { %v1723_v40 = vpop.f32.mrb[24].mxu0 }
 0xab9   :  { %v1306_v42 = vadd.f32 %v1723_v40, %v1450_v39  ;;  %v1297_v50 = vpop.f32.mrb[25].mxu0 }
 0xaba   :  { %v1298_v51 = vadd.f32 %v1450_v39, %v1297_v50  ;;  %v1724_v52 = vpop.f32.mrb[26].mxu0 }
 0xabb   :  { %v1465_v53 = vmul.f32 -1.442695, %v1306_v42  ;;  %v1309_v54 = vadd.f32 %v1724_v52, %v1450_v39  ;;  %v1300_v55 = vpop.f32.mrb[27].mxu0 }
 0xabc   :  { %v1463_v56 = vmul.f32 -1.442695, %v1298_v51  ;;  %v1301_v57 = vadd.f32 %v1450_v39, %v1300_v55 }
 0xabd   :  { %1790 = vpow2.f32 %v1465_v53  ;;  %v1466_v58 = vmul.f32 -1.442695, %v1309_v54 }
 0xabe   :  { %1792 = vpow2.f32 %v1463_v56  ;;  %v1464_v59 = vmul.f32 -1.442695, %v1301_v57 }
 0xabf   :  { %1794 = vpow2.f32 %v1466_v58 }
 0xac0   :  { %1796 = vpow2.f32 %v1464_v59 }
 0xac7   :  { %v1791_v60 = vpop.eup %1790 }
 0xac8   :  { %v1793_v61 = vpop.eup %1792  ;;  %v1342_v62 = vadd.f32 1.0, %v1791_v60 }
 0xac9   :  { %v1795_v63 = vpop.eup %1794  ;;  %v1340_v0 = vadd.f32 1.0, %v1793_v61 }
 0xaca   :  { %v1797_v1 = vpop.eup %1796  ;;  %1798 = vrcp.f32 %v1342_v62  ;;  %v1343_v2 = vadd.f32 1.0, %v1795_v63 }
 0xacb   :  { %1800 = vrcp.f32 %v1340_v0  ;;  %v1341_v3 = vadd.f32 1.0, %v1797_v1 }
 0xacc   :  { %1802 = vrcp.f32 %v1343_v2 }
 0xacd   :  { %1804 = vrcp.f32 %v1341_v3 }
 0xad4   :  { %v1799_v4 = vpop.eup %1798 }
 0xad5   :  { %v1801_v5 = vpop.eup %1800  ;;  %1374 = vst [vmem:[%s2076_s4 + $0x30] sm:$0xff] %v1799_v4 }
 0xad6   :  { %v1803_v10 = vpop.eup %1802  ;;  %1372 = vst [vmem:[%s2076_s4 + $0x20] sm:$0xff] %v1801_v5 }
 0xad7   :  { %v1805_v44 = vpop.eup %1804  ;;  %1375 = vst [vmem:[%s2076_s4 + $0x38] sm:$0xff] %v1803_v10 }
 0xad8   :  { %1373 = vst [vmem:[%s2076_s4 + $0x28] sm:$0xff] %v1805_v44 }
 0xad9   :  { %1380 = vsyncpa [#allocation3], 1 }

</bundles_post_ra>
